<compile_context>
chip_gen: v5e
topology: v5e:2x2
jax: 0.10.0
libtpu: 0.0.40
codegen_flags: <defaults>
</compile_context>

<pallas_src>
import functools

import jax
import jax.numpy as jnp
from jax.experimental import pallas as pl
from jax.experimental.pallas import tpu as pltpu

# Module hyperparameters for the example run.
NODE_CHANNELS = 4
FEATURE_CODE_SIZE = 32
CLASSIFIER_HIDDEN_SIZE = 32


def _node_classifier_kernel(x_ref, wf_ref, bf_ref, w2_ref, b2_ref, o_ref):
    # x_ref: (TB, K)   wf_ref: (K, H)   bf_ref: (1, H)   w2_ref: (H, 4)   b2_ref: (1, 4)
    # Fused conv1+mlp1 (single MXU matmul, f32 accumulation) + bias.
    h1 = jnp.dot(x_ref[...], wf_ref[...], preferred_element_type=jnp.float32) + bf_ref[...]
    # ELU(alpha=1); jnp.minimum before exp keeps the positive branch overflow-safe.
    h1 = jnp.where(h1 > 0, h1, jnp.exp(jnp.minimum(h1, 0.0)) - 1.0)
    # mlp2
    out = jnp.dot(h1.astype(w2_ref.dtype), w2_ref[...],
                  preferred_element_type=jnp.float32) + b2_ref[...]
    o_ref[...] = out.astype(o_ref.dtype)


def _ceil_to(x, m):
    return -(-x // m) * m


@functools.partial(jax.jit, static_argnames=("block_b", "compute_dtype"))
def node_classifier_forward(x, conv_w, conv_b, mlp1_w, mlp1_b, mlp2_w, mlp2_b,
                            *, block_b=1024, compute_dtype=jnp.float32):
    """JAX/Pallas equivalent of _NodeClassifier.forward.

    Args:
      x:       (B, C, 4, 4, 4) float32 node features.
      conv_w:  (F, C, 4, 4, 4) Conv3d weight, conv_b: (F,)
      mlp1_w:  (H, F) Linear weight, mlp1_b: (H,)
      mlp2_w:  (4, H) Linear weight, mlp2_b: (4,)
      block_b: batch tile size (sweepable; 1024-2048 amortizes per-step overhead).
      compute_dtype: dtype for x / matmul weights (f32 default; bf16 halves HBM
        traffic for x at the cost of ~1e-2 relative error).
    Returns:
      (B, 4) float32 logits.
    """
    B, C, D, Hh, Ww = x.shape
    assert (D, Hh, Ww) == (4, 4, 4), "node features must be (B, C, 4, 4, 4)"
    F = conv_w.shape[0]
    H = mlp1_w.shape[0]
    O = mlp2_w.shape[0]
    K = C * 4 * 4 * 4  # flattened conv receptive field (lane-dense: 256 for C=4)

    # --- Layout plumbing + algebraic conv1/mlp1 fusion (tiny, one-time) ------
    x2d = x.reshape(B, K).astype(compute_dtype)
    wc = conv_w.reshape(F, K).T.astype(jnp.float32)        # (K, F)
    w1 = mlp1_w.T.astype(jnp.float32)                      # (F, H)
    wf = (wc @ w1).astype(compute_dtype)                   # fused (K, H) weight
    bf = (conv_b.reshape(1, F) @ w1 + mlp1_b.reshape(1, H)).astype(jnp.float32)  # (1, H)
    w2 = mlp2_w.T.astype(compute_dtype)                    # (H, O)
    b2 = mlp2_b.reshape(1, O).astype(jnp.float32)          # (1, O)

    # --- Batch tiling ---------------------------------------------------------
    # Tiny batches: single full-batch tile (block dim == array dim satisfies the
    # (8,128) rule).  Larger batches: 8-aligned tiles, capped at block_b, and
    # sized so the grid has >= 2 steps -> "parallel" can shard across v7x's 2
    # TensorCores.  VMEM: tb=1024 x 256 f32 = 1 MiB x 2 buffers; weights < 64 KiB.
    if B <= 8:
        tb = B
    else:
        tb = min(block_b, _ceil_to(pl.cdiv(B, 2), 8))
    grid = (pl.cdiv(B, tb),)

    bytes_per = jnp.dtype(compute_dtype).itemsize
    cost = pl.CostEstimate(
        flops=2 * B * K * H + 2 * B * H * O,
        transcendentals=B * H,  # exp in ELU
        bytes_accessed=(B * K * bytes_per + B * O * 4
                        + (K * H + H * O) * bytes_per + (H + O) * 4),
    )

    out = pl.pallas_call(
        _node_classifier_kernel,
        out_shape=jax.ShapeDtypeStruct((B, O), jnp.float32),
        grid_spec=pltpu.PrefetchScalarGridSpec(
            num_scalar_prefetch=0,
            grid=grid,
            in_specs=[
                pl.BlockSpec((tb, K), lambda i: (i, 0)),   # activations: tiled on batch
                pl.BlockSpec((K, H), lambda i: (0, 0)),    # fused conv1+mlp1 weight
                pl.BlockSpec((1, H), lambda i: (0, 0)),    # fused bias
                pl.BlockSpec((H, O), lambda i: (0, 0)),    # mlp2 weight
                pl.BlockSpec((1, O), lambda i: (0, 0)),    # mlp2 bias
            ],
            out_specs=pl.BlockSpec((tb, O), lambda i: (i, 0)),
        ),
        compiler_params=pltpu.CompilerParams(
            # Batch tiles are independent -> shard grid across TensorCores (v7x).
            dimension_semantics=("parallel",),
        ),
        cost_estimate=cost,
    )(x2d, wf, bf, w2, b2)
    return out


def _reference(x, conv_w, conv_b, mlp1_w, mlp1_b, mlp2_w, mlp2_b):
    """Pure-JAX reference matching the PyTorch module."""
    h0 = jnp.einsum("bcdhw,fcdhw->bf", x, conv_w) + conv_b
    h1 = h0 @ mlp1_w.T + mlp1_b
    h1 = jnp.where(h1 > 0, h1, jnp.exp(jnp.minimum(h1, 0.0)) - 1.0)  # ELU(alpha=1)
    return h1 @ mlp2_w.T + mlp2_b


if __name__ == "__main__":
    key = jax.random.PRNGKey(0)
    kx, kcw, kcb, k1w, k1b, k2w, k2b, kx2 = jax.random.split(key, 8)

    B, C, F, H = 2, NODE_CHANNELS, FEATURE_CODE_SIZE, CLASSIFIER_HIDDEN_SIZE

    # Deterministic small example inputs / parameters.
    x = jax.random.normal(kx, (B, C, 4, 4, 4), dtype=jnp.float32)
    conv_w = jax.random.normal(kcw, (F, C, 4, 4, 4), dtype=jnp.float32) * (1.0 / (C * 64) ** 0.5)
    conv_b = jax.random.normal(kcb, (F,), dtype=jnp.float32) * 0.1
    mlp1_w = jax.random.normal(k1w, (H, F), dtype=jnp.float32) * (1.0 / F ** 0.5)
    mlp1_b = jax.random.normal(k1b, (H,), dtype=jnp.float32) * 0.1
    mlp2_w = jax.random.normal(k2w, (4, H), dtype=jnp.float32) * (1.0 / H ** 0.5)
    mlp2_b = jax.random.normal(k2b, (4,), dtype=jnp.float32) * 0.1

    # Primary check: module-sized batch (B=2, single tile).
    out = node_classifier_forward(x, conv_w, conv_b, mlp1_w, mlp1_b, mlp2_w, mlp2_b)
    out = jax.block_until_ready(out)
    ref = jax.block_until_ready(_reference(x, conv_w, conv_b, mlp1_w, mlp1_b, mlp2_w, mlp2_b))

    assert out.shape == (B, 4), out.shape
    assert out.dtype == jnp.float32, out.dtype
    assert bool(jnp.all(jnp.isfinite(out)))
    assert bool(jnp.allclose(out, ref, rtol=1e-3, atol=1e-3)), (out, ref)

    # Secondary check: exercise the multi-tile (grid >= 2) path.
    B2 = 64
    x_big = jax.random.normal(kx2, (B2, C, 4, 4, 4), dtype=jnp.float32)
    out_big = jax.block_until_ready(
        node_classifier_forward(x_big, conv_w, conv_b, mlp1_w, mlp1_b, mlp2_w, mlp2_b))
    ref_big = jax.block_until_ready(
        _reference(x_big, conv_w, conv_b, mlp1_w, mlp1_b, mlp2_w, mlp2_b))
    assert out_big.shape == (B2, 4), out_big.shape
    assert bool(jnp.allclose(out_big, ref_big, rtol=1e-3, atol=1e-3))

    print("KERNEL_OK")
</pallas_src>

<mosaic_0001>
module attributes {stable_mosaic.version = 11 : i64} {
  func.func @_node_classifier_kernel(%arg0: i32, %arg1: memref<2x256xf32, #tpu.memory_space<vmem>>, %arg2: memref<256x32xf32, #tpu.memory_space<vmem>>, %arg3: memref<1x32xf32, #tpu.memory_space<vmem>>, %arg4: memref<32x4xf32, #tpu.memory_space<vmem>>, %arg5: memref<1x4xf32, #tpu.memory_space<vmem>>, %arg6: memref<2x4xf32, #tpu.memory_space<vmem>>) attributes {dimension_semantics = [#tpu.dimension_semantics<parallel>], iteration_bounds = array<i64: 1>, scalar_prefetch = 0 : i64, scratch_operands = 0 : i64, tpu.core_type = #tpu.core_type<tc>, window_params = [{transform_indices = @transform_0, window_bounds = array<i64: 2, 256>}, {pipeline_mode = #tpu.pipeline_mode<synchronous>, transform_indices = @transform_1, window_bounds = array<i64: 256, 32>}, {pipeline_mode = #tpu.pipeline_mode<synchronous>, transform_indices = @transform_2, window_bounds = array<i64: 1, 32>}, {pipeline_mode = #tpu.pipeline_mode<synchronous>, transform_indices = @transform_3, window_bounds = array<i64: 32, 4>}, {pipeline_mode = #tpu.pipeline_mode<synchronous>, transform_indices = @transform_4, window_bounds = array<i64: 1, 4>}, {transform_indices = @transform_5, window_bounds = array<i64: 2, 4>}]} {
    %c0 = arith.constant 0 : index
    %c0_0 = arith.constant 0 : index
    %0 = vector.load %arg1[%c0, %c0_0] : memref<2x256xf32, #tpu.memory_space<vmem>>, vector<2x256xf32>
    %c0_1 = arith.constant 0 : index
    %c0_2 = arith.constant 0 : index
    %1 = vector.load %arg2[%c0_1, %c0_2] : memref<256x32xf32, #tpu.memory_space<vmem>>, vector<256x32xf32>
    %cst = arith.constant dense<0.000000e+00> : vector<2x32xf32>
    %2 = tpu.matmul %0, %1, %cst {dimension_numbers = #tpu.dot_dimension_numbers<[1], [0], [0], [1], [0, 0, 1, 1], [], []>} : vector<2x256xf32>, vector<256x32xf32>, vector<2x32xf32> -> vector<2x32xf32>
    %c0_3 = arith.constant 0 : index
    %c0_4 = arith.constant 0 : index
    %3 = vector.load %arg3[%c0_3, %c0_4] : memref<1x32xf32, #tpu.memory_space<vmem>>, vector<1x32xf32>
    %4 = vector.broadcast %3 : vector<1x32xf32> to vector<2x32xf32>
    %5 = arith.addf %2, %4 : vector<2x32xf32>
    %cst_5 = arith.constant 0.000000e+00 : f32
    %6 = vector.broadcast %cst_5 : f32 to vector<2x32xf32>
    %7 = arith.cmpf ogt, %5, %6 : vector<2x32xf32>
    %cst_6 = arith.constant 0.000000e+00 : f32
    %8 = vector.broadcast %cst_6 : f32 to vector<2x32xf32>
    %9 = arith.minimumf %5, %8 : vector<2x32xf32>
    %10 = math.exp %9 : vector<2x32xf32>
    %cst_7 = arith.constant 1.000000e+00 : f32
    %11 = vector.broadcast %cst_7 : f32 to vector<2x32xf32>
    %12 = arith.subf %10, %11 : vector<2x32xf32>
    %13 = arith.select %7, %5, %12 : vector<2x32xi1>, vector<2x32xf32>
    %c0_8 = arith.constant 0 : index
    %c0_9 = arith.constant 0 : index
    %14 = vector.load %arg4[%c0_8, %c0_9] : memref<32x4xf32, #tpu.memory_space<vmem>>, vector<32x4xf32>
    %cst_10 = arith.constant dense<0.000000e+00> : vector<2x4xf32>
    %15 = tpu.matmul %13, %14, %cst_10 {dimension_numbers = #tpu.dot_dimension_numbers<[1], [0], [0], [1], [0, 0, 1, 1], [], []>} : vector<2x32xf32>, vector<32x4xf32>, vector<2x4xf32> -> vector<2x4xf32>
    %c0_11 = arith.constant 0 : index
    %c0_12 = arith.constant 0 : index
    %16 = vector.load %arg5[%c0_11, %c0_12] : memref<1x4xf32, #tpu.memory_space<vmem>>, vector<1x4xf32>
    %17 = vector.broadcast %16 : vector<1x4xf32> to vector<2x4xf32>
    %18 = arith.addf %15, %17 : vector<2x4xf32>
    %c0_13 = arith.constant 0 : index
    %c0_14 = arith.constant 0 : index
    %19 = vector.load %arg6[%c0_13, %c0_14] : memref<2x4xf32, #tpu.memory_space<vmem>>, vector<2x4xf32>
    tpu.vector_store %arg6[%c0_13, %c0_14], %18 {strides = array<i32>} : memref<2x4xf32, #tpu.memory_space<vmem>>, vector<2x4xf32>,
    return
  }
  func.func @transform_0(%arg0: i32) -> (i32, i32) {
    %c0_i32 = arith.constant 0 : i32
    %c0_i32_0 = arith.constant 0 : i32
    return %arg0, %c0_i32 : i32, i32
  }
  func.func @transform_1(%arg0: i32) -> (i32, i32) {
    %c0_i32 = arith.constant 0 : i32
    %c0_i32_0 = arith.constant 0 : i32
    %c0_i32_1 = arith.constant 0 : i32
    return %c0_i32, %c0_i32_0 : i32, i32
  }
  func.func @transform_2(%arg0: i32) -> (i32, i32) {
    %c0_i32 = arith.constant 0 : i32
    %c0_i32_0 = arith.constant 0 : i32
    %c0_i32_1 = arith.constant 0 : i32
    return %c0_i32, %c0_i32_0 : i32, i32
  }
  func.func @transform_3(%arg0: i32) -> (i32, i32) {
    %c0_i32 = arith.constant 0 : i32
    %c0_i32_0 = arith.constant 0 : i32
    %c0_i32_1 = arith.constant 0 : i32
    return %c0_i32, %c0_i32_0 : i32, i32
  }
  func.func @transform_4(%arg0: i32) -> (i32, i32) {
    %c0_i32 = arith.constant 0 : i32
    %c0_i32_0 = arith.constant 0 : i32
    %c0_i32_1 = arith.constant 0 : i32
    return %c0_i32, %c0_i32_0 : i32, i32
  }
  func.func @transform_5(%arg0: i32) -> (i32, i32) {
    %c0_i32 = arith.constant 0 : i32
    %c0_i32_0 = arith.constant 0 : i32
    return %arg0, %c0_i32 : i32, i32
  }
}

</mosaic_0001>

<bundles_post_ra>
// kernel: node_classifier_forward.1
= control target key start
LH: loop header
LB: loop body
LE: loop exit
PB: predicated region body
PF: predicated region fallthrough
CT: control target
= control target key end

     0   :  { %s344_s0 = inlined_call_operand.vmem [shape: f32[2,256], index: 0, kind: input, shape index: {}]   ;;  %s345_s1 = inlined_call_operand.vmem [shape: f32[256,32], index: 1, kind: input, shape index: {}]   ;;  %s346_s2 = inlined_call_operand.vmem [shape: f32[1,32], index: 2, kind: input, shape index: {}]   ;;  %s347_s3 = inlined_call_operand.vmem [shape: f32[32,4], index: 3, kind: input, shape index: {}]   ;;  %s348_s4 = inlined_call_operand.vmem [shape: f32[1,4], index: 4, kind: input, shape index: {}]   ;;  %s349_s5 = inlined_call_operand.hbm [shape: f32[2,4], index: 5, kind: output, shape index: {}]  }
   0x1   :  { %v37_v0 = vld [vmem:[%s345_s1 + $0x78] sm:$0xff]  ;;  %v36_v1 = vld [vmem:[%s345_s1 + $0x70] sm:$0xff]  ;;  %v35_v4 = vld [vmem:[%s345_s1 + $0x68] sm:$0xff] }
   0x2   :  { %v53_v2 = vld [vmem:[%s345_s1 + $0xf8] sm:$0xff]  ;;  %64 = vmatpush.msra.mxu0 %v37_v0  ;;  %v52_v3 = vld [vmem:[%s345_s1 + $0xf0] sm:$0xff]  ;;  %v51_v5 = vld [vmem:[%s345_s1 + $0xe8] sm:$0xff] }
   0x3   :  { %84 = vmatpush.msra.mxu1 %v53_v2  ;;  %v34_v6 = vld [vmem:[%s345_s1 + $0x60] sm:$0xff]  ;;  %v33_v8 = vld [vmem:[%s345_s1 + $0x58] sm:$0xff]  ;;  %v32_v10 = vld [vmem:[%s345_s1 + $0x50] sm:$0xff] }
   0x4   :  { %65 = vmatpush.msra.mxu0 %v36_v1  ;;  %v50_v7 = vld [vmem:[%s345_s1 + $0xe0] sm:$0xff]  ;;  %v49_v9 = vld [vmem:[%s345_s1 + $0xd8] sm:$0xff]  ;;  %v48_v11 = vld [vmem:[%s345_s1 + $0xd0] sm:$0xff] }
   0x5   :  { %85 = vmatpush.msra.mxu1 %v52_v3  ;;  %v31_v12 = vld [vmem:[%s345_s1 + $0x48] sm:$0xff]  ;;  %v21_v14 = vld [vmem:[%s344_s0] sm:$0xf] }
   0x6   :  { %66 = vmatpush.msra.mxu0 %v35_v4  ;;  %v47_v13 = vld [vmem:[%s345_s1 + $0xc8] sm:$0xff]  ;;  %v30_v15 = vld [vmem:[%s345_s1 + $0x40] sm:$0xff]  ;;  %59 = vst [vmem:[#allocation1] ss:$4 sm:$0xff] %v21_v14 }
   0x7   :  { %86 = vmatpush.msra.mxu1 %v51_v5  ;;  %v46_v16 = vld [vmem:[%s345_s1 + $0xc0] sm:$0xff] }
   0x8   :  { %67 = vmatpush.msra.mxu0 %v34_v6 }
   0x9   :  { %87 = vmatpush.msra.mxu1 %v50_v7 }
   0xa   :  { %68 = vmatpush.msra.mxu0 %v33_v8 }
   0xb   :  { %88 = vmatpush.msra.mxu1 %v49_v9 }
   0xc   :  { %69 = vmatpush.msra.mxu0 %v32_v10 }
   0xd   :  { %89 = vmatpush.msra.mxu1 %v48_v11 }
   0xe   :  { %10 = vsyncpa [#allocation3], 0  ;;  %70 = vmatpush.msra.mxu0 %v31_v12  ;;  %v29_v17 = vld [vmem:[%s345_s1 + $0x38] sm:$0xff]  ;;  %v28_v19 = vld [vmem:[%s345_s1 + $0x30] sm:$0xff]  ;;  %vm118_vm0 = vcmask 261120   ;;  %s193_s17 = smov [#allocation2]  }
   0xf   :  { %90 = vmatpush.msra.mxu1 %v47_v13  ;;  %v45_v18 = vld [vmem:[%s345_s1 + $0xb8] sm:$0xff]  ;;  %v44_v20 = vld [vmem:[%s345_s1 + $0xb0] sm:$0xff]  ;;  %v27_v21 = vld [vmem:[%s345_s1 + $0x28] sm:$0xff]  ;;  %s149_s18 = sshll.u32 %s193_s17, 4  ;;  %s151_s20 = sshll.u32 %s349_s5, 4  ;;  %vm142_vm2 = vcmask 25600   ;;  %s150_s18 = int_to_ptr.vmem [resolvable:$true] %s149_s18  ;;  %s152_s20 = int_to_ptr.hbm [resolvable:$true] %s151_s20 }
  0x10   :  { %71 = vmatpush.msra.mxu0 %v30_v15  ;;  %v43_v22 = vld [vmem:[%s345_s1 + $0xa8] sm:$0xff]  ;;  %v26_v23 = vld [vmem:[%s345_s1 + $0x20] sm:$0xff]  ;;  %v25_v25 = vld [vmem:[%s345_s1 + $0x18] sm:$0xff] }
  0x11   :  { %91 = vmatpush.msra.mxu1 %v46_v16  ;;  %v42_v24 = vld [vmem:[%s345_s1 + $0xa0] sm:$0xff]  ;;  %v41_v26 = vld [vmem:[%s345_s1 + $0x98] sm:$0xff]  ;;  %v24_v27 = vld [vmem:[%s345_s1 + $0x10] sm:$0xff] }
  0x12   :  { %72 = vmatpush.msra.mxu0 %v29_v17  ;;  %v40_v28 = vld [vmem:[%s345_s1 + $0x90] sm:$0xff]  ;;  %v23_v29 = vld [vmem:[%s345_s1 + $0x8] sm:$0xff]  ;;  %v22_v31 = vld [vmem:[%s345_s1] sm:$0xff] }
  0x13   :  { %92 = vmatpush.msra.mxu1 %v45_v18  ;;  %v39_v30 = vld [vmem:[%s345_s1 + $0x88] sm:$0xff]  ;;  %v38_v32 = vld [vmem:[%s345_s1 + $0x80] sm:$0xff]  ;;  %v113_v35 = vld [vmem:[%s347_s3 + $0x18] sm:$0xff] }
  0x14   :  { %73 = vmatpush.msra.mxu0 %v28_v19  ;;  %v60_v33 = vld.sshfl [vmem:[#allocation1] sm:$0xff pattern:$0x73625140]  ;;  %v61_v34 = vld.sshfl [vmem:[#allocation1 + $0x8] sm:$0xff pattern:$0x73625140]  ;;  %134 = vmatpush.msra.mxu2 %v113_v35 }
  0x15   :  { %93 = vmatpush.msra.mxu1 %v44_v20  ;;  %v112_v36 = vld [vmem:[%s347_s3 + $0x10] sm:$0xff]  ;;  %v111_v37 = vld [vmem:[%s347_s3 + $0x8] sm:$0xff]  ;;  %v110_v38 = vld [vmem:[%s347_s3] sm:$0xff] }
  0x16   :  { %74 = vmatpush.msra.mxu0 %v27_v21  ;;  %135 = vmatpush.msra.mxu2 %v112_v36  ;;  %v163_v39 = vld [vmem:[%s346_s2] ss:$0 sm:$0xff] }
  0x17   :  { %94 = vmatpush.msra.mxu1 %v43_v22  ;;  %v164_v49 = vld [vmem:[%s348_s4] ss:$0 sm:$0xff] }
  0x18   :  { %75 = vmatpush.msra.mxu0 %v26_v23  ;;  %136 = vmatpush.msra.mxu2 %v111_v37 }
  0x19   :  { %95 = vmatpush.msra.mxu1 %v42_v24 }
  0x1a   :  { %76 = vmatpush.msra.mxu0 %v25_v25  ;;  %137 = vmatpush.msra.mxu2 %v110_v38 }
  0x1b   :  { %96 = vmatpush.msra.mxu1 %v41_v26 }
  0x1c   :  { %77 = vmatpush.msra.mxu0 %v24_v27 }
  0x1d   :  { %97 = vmatpush.msra.mxu1 %v40_v28 }
  0x1e   :  { %78 = vmatpush.msra.mxu0 %v23_v29 }
  0x1f   :  { %98 = vmatpush.msra.mxu1 %v39_v30 }
  0x20   :  { %79 = vmatpush.msra.mxu0 %v22_v31 }
  0x21   :  { %99 = vmatpush.msra.mxu1 %v38_v32  ;;  %80 = vmatmul.f32.vlgmr.msra.gmra.mxu0 %v60_v33 }
  0x22   :  { %100 = vmatmul.f32.vlgmr.msra.gmra.mxu1 %v61_v34 }
  0x9e   :  { %v81_v40 = vpop.f32.mrf.mxu0 }
  0x9f   :  { %v101_v41 = vpop.f32.mrf.mxu1  ;;  %v82_v42 = vadd.f32 %v163_v39, %v81_v40 }
  0xa1   :  { %v102_v43 = vadd.f32 %v101_v41, %v82_v42 }
  0xa3   :  { %v105_v44 = vmin.f32 %v102_v43, 0.0  ;;  %vm104_vm1 = vcmp.gt.f32.partialorder %v102_v43, 0.0 }
  0xa5   :  { %v106_v45 = vmul.f32 1.442695, %v105_v44 }
  0xa7   :  { %165 = vpow2.f32 %v106_v45 }
  0xad   :  { %v166_v46 = vpop.eup %165 }
  0xae   :  { %v160_v47 = vadd.f32 -1.0, %v166_v46 }
  0xb0   :  { %v109_v48 = vsel %vm104_vm1, %v102_v43, %v160_v47 }
  0xb1   :  { %161 = vmatmul.msk.f32.vlgmr.msra.gmra.mxu2 %vm118_vm0, %v109_v48 }
 0x134   :  { %v139_v50 = vpop.f32.mrf.mxu2 }
 0x135   :  { %v140_v51 = vadd.f32 %v164_v49, %v139_v50 }
 0x137   :  { %143 = vst.msk [vmem:[#allocation2] sm:$0x3] %vm142_vm2, %v140_v51 }
 0x138   :  { %154 = dma.vmem_to_hbm [thread:$0]  %s150_s18, 32, %s152_s20, [#allocation3]  }
 0x139   :  { %191 = dma.done.wait [#allocation3], 32  }
 0x13a   :  { %192 = vsyncadd [#allocation3], 4294967264 }
 0x13b   :  { %159 = vsyncpa [#allocation3], 1 }

</bundles_post_ra>
